<compile_context>
chip_gen: v5e
topology: v5e:2x2
jax: 0.10.0
libtpu: 0.0.40
codegen_flags: <defaults>
</compile_context>

<pallas_src>
import functools

import numpy as np
import jax
import jax.numpy as jnp
from jax import lax
from jax.experimental import pallas as pl
from jax.experimental.pallas import tpu as pltpu

EPS = 1e-5  # nn.BatchNorm2d default eps


def _bn_rows(y, gamma, beta):
    """BatchNorm (train mode, biased var) for (C, M): per-channel stats over lanes."""
    inv_m = 1.0 / y.shape[-1]
    mean = jnp.sum(y, axis=-1, keepdims=True) * inv_m
    ex2 = jnp.sum(y * y, axis=-1, keepdims=True) * inv_m
    var = ex2 - mean * mean                        # single pass over the tile
    scale = lax.rsqrt(var + EPS) * gamma           # fold per-channel scale once
    return (y - mean) * scale + beta


def _se_resnet_kernel(
    x_ref,                                 # (Cin, M)   channels-on-sublanes input
    tapmask_ref,                           # (9, M)     0/1 conv boundary masks
    poolmask_ref,                          # (N, M)     0/1 per-sample lane masks
    w1t_ref, b1_ref, g1_ref, be1_ref,      # (width, Cin), (width, 1) x3
    w2m_ref, b2_ref, g2_ref, be2_ref,      # (width, 9*width), (width, 1) x3
    w3t_ref, b3_ref, g3_ref, be3_ref,      # (Cout, width), (Cout, 1) x3
    sw1t_ref, sw2t_ref,                    # (Cr, Cout), (Cout, Cr)
    o_ref,                                 # (Cout, M)  lane-dense output slab
    pad_ref,                               # scratch (width, M + 2*(W+1))
    col_ref,                               # scratch (9*width, M)  im2col
    *, img_w,
):
    m = x_ref.shape[1]
    n_batch = poolmask_ref.shape[0]
    hw = m // n_batch
    width = w1t_ref.shape[0]
    cout, cr = sw2t_ref.shape
    padl = img_w + 1

    x_t = x_ref[...]                                            # (Cin, M)

    # ---- conv1 (1x1) + bn1 + relu -------------------------------------------
    y1 = jnp.dot(w1t_ref[...], x_t, preferred_element_type=jnp.float32) + b1_ref[...]
    y1 = jnp.maximum(_bn_rows(y1, g1_ref[...], be1_ref[...]), 0.0)

    # ---- conv2 (3x3, pad=1, stride=1): im2col -> one (w,9w)@(9w,M) matmul ----
    # lane-padded halo copy of y1; only the two halo strips are zero-filled.
    zhalo = jnp.zeros((width, padl), jnp.float32)
    pad_ref[:, pl.ds(0, padl)] = zhalo
    pad_ref[:, pl.ds(padl + m, padl)] = zhalo
    pad_ref[:, pl.ds(padl, m)] = y1
    tapmask = tapmask_ref[...]
    for kh in range(3):
        for kw in range(3):
            t = kh * 3 + kw
            off = (kh - 1) * img_w + (kw - 1)
            shifted = pad_ref[:, pl.ds(padl + off, m)]          # (width, M)
            col_ref[pl.ds(t * width, width), :] = shifted * tapmask[t:t + 1, :]
    y2 = (jnp.dot(w2m_ref[...], col_ref[...], preferred_element_type=jnp.float32)
          + b2_ref[...])
    y2 = jnp.maximum(_bn_rows(y2, g2_ref[...], be2_ref[...]), 0.0)

    # ---- conv3 (1x1) + bn3 --------------------------------------------------
    y3 = jnp.dot(w3t_ref[...], y2, preferred_element_type=jnp.float32) + b3_ref[...]
    y3 = _bn_rows(y3, g3_ref[...], be3_ref[...])

    # ---- SE: fc1 fused with avg-pool (lane-wide matmul); fc2 on the VPU ------
    se = jnp.dot(sw1t_ref[...], y3, preferred_element_type=jnp.float32)   # (Cr, M)
    poolmask = poolmask_ref[...]
    sw2t = sw2t_ref[...]
    inv_hw = 1.0 / hw
    gate = jnp.zeros((cout, m), jnp.float32)
    for n in range(n_batch):
        pm = poolmask[n:n + 1, :]                                         # (1, M)
        h_n = jnp.maximum(
            jnp.sum(se * pm, axis=-1, keepdims=True) * inv_hw, 0.0)       # (Cr, 1)
        acc = jnp.zeros((cout, 1), jnp.float32)
        for r in range(cr):                                               # VPU MACs
            acc = acc + sw2t[:, r:r + 1] * h_n[r:r + 1, :]
        gate = gate + jax.nn.sigmoid(acc) * pm                            # disjoint masks

    # ---- SE scale + residual add + relu (all lane-dense VPU) -----------------
    o_ref[...] = jnp.maximum(y3 * gate + x_t, 0.0)


@jax.jit
def resnet_se_block(x_nchw, params):
    """x_nchw: (N, Cin, H, W) float32. Returns (N, Cout, H, W)."""
    N, Cin, H, W = x_nchw.shape
    width = params["w1"].shape[1]
    Cout = params["w3"].shape[1]
    # downsample=None in the PyTorch block -> the residual add requires this.
    assert Cin == Cout, (
        f"downsample=None requires inplanes == planes*expansion (got {Cin} vs {Cout})")
    HW = H * W
    M = N * HW

    # Input relayout: leading-axis block permute (contiguous HW planes intact).
    x_t = jnp.transpose(x_nchw.reshape(N, Cin, HW), (1, 0, 2)).reshape(Cin, M)

    # Precomputed 0/1 masks (shape-only; constant-folded under jit).
    m_idx = jnp.arange(M, dtype=jnp.int32)
    w_idx = m_idx % W
    h_idx = (m_idx // W) % H
    s_idx = m_idx // HW
    taps = []
    for dh in (-1, 0, 1):
        for dw in (-1, 0, 1):
            taps.append((h_idx + dh >= 0) & (h_idx + dh < H) &
                        (w_idx + dw >= 0) & (w_idx + dw < W))
    tap_mask = jnp.stack(taps).astype(jnp.float32)                        # (9, M)
    pool_mask = (s_idx[None, :] ==
                 jnp.arange(N, dtype=jnp.int32)[:, None]).astype(jnp.float32)  # (N, M)

    # Weights pre-transposed for the channels-on-sublanes (C, M) layout.
    w1t = params["w1"].T                                                  # (width, Cin)
    w2m = jnp.transpose(params["w2"], (3, 0, 1, 2)).reshape(width, 9 * width)
    w3t = params["w3"].T                                                  # (Cout, width)
    sw1t = params["sw1"].T                                                # (Cr, Cout)
    sw2t = params["sw2"].T                                                # (Cout, Cr)
    b1, g1, be1 = params["b1"].T, params["g1"].T, params["be1"].T         # (width, 1)
    b2, g2, be2 = params["b2"].T, params["g2"].T, params["be2"].T
    b3, g3, be3 = params["b3"].T, params["g3"].T, params["be3"].T

    out_slab = pl.pallas_call(
        functools.partial(_se_resnet_kernel, img_w=W),
        out_shape=jax.ShapeDtypeStruct((Cout, M), jnp.float32),
        scratch_shapes=[
            pltpu.VMEM((width, M + 2 * (W + 1)), jnp.float32),   # halo-padded y1
            pltpu.VMEM((9 * width, M), jnp.float32),             # im2col
        ],
        compiler_params=pltpu.CompilerParams(vmem_limit_bytes=32 * 1024 * 1024),
    )(x_t, tap_mask, pool_mask,
      w1t, b1, g1, be1, w2m, b2, g2, be2, w3t, b3, g3, be3, sw1t, sw2t)

    # Lane-dense (Cout, M) slab -> NCHW (tiny leading-axis block permute).
    return jnp.transpose(out_slab.reshape(Cout, N, H, W), (1, 0, 2, 3))


# ---------------------- pure-JAX reference (for checking) --------------------
def reference_forward(x_nchw, p):
    x = jnp.transpose(x_nchw, (0, 2, 3, 1))

    def bn(y, g, b):
        mean = jnp.mean(y, axis=(0, 1, 2), keepdims=True)
        var = jnp.mean((y - mean) ** 2, axis=(0, 1, 2), keepdims=True)
        return (y - mean) / jnp.sqrt(var + EPS) * g + b

    y = jnp.einsum("nhwc,cd->nhwd", x, p["w1"]) + p["b1"]
    y = jnp.maximum(bn(y, p["g1"], p["be1"]), 0.0)
    y = lax.conv_general_dilated(
        y, p["w2"], window_strides=(1, 1), padding=((1, 1), (1, 1)),
        dimension_numbers=("NHWC", "HWIO", "NHWC")) + p["b2"]
    y = jnp.maximum(bn(y, p["g2"], p["be2"]), 0.0)
    y = jnp.einsum("nhwc,cd->nhwd", y, p["w3"]) + p["b3"]
    y = bn(y, p["g3"], p["be3"])
    pooled = jnp.mean(y, axis=(1, 2))
    h = jnp.maximum(pooled @ p["sw1"], 0.0)
    gate = jax.nn.sigmoid(h @ p["sw2"])
    y = jnp.maximum(y * gate[:, None, None, :] + x, 0.0)
    return jnp.transpose(y, (0, 3, 1, 2))


if __name__ == "__main__":
    # ResNetBlock(inplanes=16, planes=4): width = 4, out channels = planes*4 = 16.
    # downsample=None requires inplanes == planes*4 for the residual add.
    N, H, W = 2, 8, 8
    inplanes, planes, base_width, groups, reduction = 16, 4, 64, 1, 16
    width = int(planes * (base_width / 64.0)) * groups        # 4
    Cout = planes * 4                                         # 16
    Cr = Cout // reduction                                    # 1

    key = jax.random.PRNGKey(0)
    ks = jax.random.split(key, 16)
    f32 = jnp.float32

    params = {
        "w1": jax.random.normal(ks[0], (inplanes, width), f32) * 0.2,
        "b1": jax.random.normal(ks[1], (1, width), f32) * 0.1,
        "g1": 1.0 + 0.1 * jax.random.normal(ks[2], (1, width), f32),
        "be1": 0.1 * jax.random.normal(ks[3], (1, width), f32),
        "w2": jax.random.normal(ks[4], (3, 3, width, width), f32) * 0.2,  # HWIO
        "b2": jax.random.normal(ks[5], (1, width), f32) * 0.1,
        "g2": 1.0 + 0.1 * jax.random.normal(ks[6], (1, width), f32),
        "be2": 0.1 * jax.random.normal(ks[7], (1, width), f32),
        "w3": jax.random.normal(ks[8], (width, Cout), f32) * 0.2,
        "b3": jax.random.normal(ks[9], (1, Cout), f32) * 0.1,
        "g3": 1.0 + 0.1 * jax.random.normal(ks[10], (1, Cout), f32),
        "be3": 0.1 * jax.random.normal(ks[11], (1, Cout), f32),
        "sw1": jax.random.normal(ks[12], (Cout, Cr), f32) * 0.3,
        "sw2": jax.random.normal(ks[13], (Cr, Cout), f32) * 0.3,
    }

    x = jax.random.normal(ks[14], (N, inplanes, H, W), f32)

    out = jax.block_until_ready(resnet_se_block(x, params))
    ref = jax.block_until_ready(reference_forward(x, params))

    assert out.shape == (N, Cout, H, W), out.shape
    assert np.allclose(np.asarray(out), np.asarray(ref), atol=1e-2, rtol=1e-2), (
        "mismatch vs reference")
    print("KERNEL_OK")
</pallas_src>

<mosaic_0001>
module attributes {stable_mosaic.version = 11 : i64} {
  func.func @_se_resnet_kernel(%arg0: memref<16x128xf32, #tpu.memory_space<vmem>>, %arg1: memref<9x128xf32, #tpu.memory_space<vmem>>, %arg2: memref<2x128xf32, #tpu.memory_space<vmem>>, %arg3: memref<4x16xf32, #tpu.memory_space<vmem>>, %arg4: memref<4x1xf32, #tpu.memory_space<vmem>>, %arg5: memref<4x1xf32, #tpu.memory_space<vmem>>, %arg6: memref<4x1xf32, #tpu.memory_space<vmem>>, %arg7: memref<4x36xf32, #tpu.memory_space<vmem>>, %arg8: memref<4x1xf32, #tpu.memory_space<vmem>>, %arg9: memref<4x1xf32, #tpu.memory_space<vmem>>, %arg10: memref<4x1xf32, #tpu.memory_space<vmem>>, %arg11: memref<16x4xf32, #tpu.memory_space<vmem>>, %arg12: memref<16x1xf32, #tpu.memory_space<vmem>>, %arg13: memref<16x1xf32, #tpu.memory_space<vmem>>, %arg14: memref<16x1xf32, #tpu.memory_space<vmem>>, %arg15: memref<1x16xf32, #tpu.memory_space<vmem>>, %arg16: memref<16x1xf32, #tpu.memory_space<vmem>>, %arg17: memref<16x128xf32, #tpu.memory_space<vmem>>, %arg18: memref<4x146xf32, #tpu.memory_space<vmem>>, %arg19: memref<36x128xf32, #tpu.memory_space<vmem>>) attributes {dimension_semantics = [], scalar_prefetch = 0 : i64, scratch_operands = 2 : i64, tpu.core_type = #tpu.core_type<tc>} {
    %c0 = arith.constant 0 : index
    %c0_0 = arith.constant 0 : index
    %0 = vector.load %arg0[%c0, %c0_0] : memref<16x128xf32, #tpu.memory_space<vmem>>, vector<16x128xf32>
    %c0_1 = arith.constant 0 : index
    %c0_2 = arith.constant 0 : index
    %1 = vector.load %arg3[%c0_1, %c0_2] : memref<4x16xf32, #tpu.memory_space<vmem>>, vector<4x16xf32>
    %cst = arith.constant dense<0.000000e+00> : vector<4x128xf32>
    %2 = tpu.matmul %1, %0, %cst {dimension_numbers = #tpu.dot_dimension_numbers<[1], [0], [0], [1], [0, 0, 1, 1], [], []>} : vector<4x16xf32>, vector<16x128xf32>, vector<4x128xf32> -> vector<4x128xf32>
    %c0_3 = arith.constant 0 : index
    %c0_4 = arith.constant 0 : index
    %3 = vector.load %arg4[%c0_3, %c0_4] : memref<4x1xf32, #tpu.memory_space<vmem>>, vector<4x1xf32>
    %4 = vector.broadcast %3 : vector<4x1xf32> to vector<4x128xf32>
    %5 = arith.addf %2, %4 : vector<4x128xf32>
    %c0_5 = arith.constant 0 : index
    %c0_6 = arith.constant 0 : index
    %6 = vector.load %arg5[%c0_5, %c0_6] : memref<4x1xf32, #tpu.memory_space<vmem>>, vector<4x1xf32>
    %c0_7 = arith.constant 0 : index
    %c0_8 = arith.constant 0 : index
    %7 = vector.load %arg6[%c0_7, %c0_8] : memref<4x1xf32, #tpu.memory_space<vmem>>, vector<4x1xf32>
    %cst_9 = arith.constant dense<0.000000e+00> : vector<4xf32>
    %8 = vector.multi_reduction <add>, %5, %cst_9 [1] : vector<4x128xf32> to vector<4xf32>
    %9 = vector.shape_cast %8 : vector<4xf32> to vector<4x1xf32>
    %cst_10 = arith.constant 7.812500e-03 : f32
    %10 = vector.broadcast %cst_10 : f32 to vector<4x1xf32>
    %11 = arith.mulf %9, %10 : vector<4x1xf32>
    %12 = arith.mulf %5, %5 : vector<4x128xf32>
    %cst_11 = arith.constant dense<0.000000e+00> : vector<4xf32>
    %13 = vector.multi_reduction <add>, %12, %cst_11 [1] : vector<4x128xf32> to vector<4xf32>
    %14 = vector.shape_cast %13 : vector<4xf32> to vector<4x1xf32>
    %cst_12 = arith.constant 7.812500e-03 : f32
    %15 = vector.broadcast %cst_12 : f32 to vector<4x1xf32>
    %16 = arith.mulf %14, %15 : vector<4x1xf32>
    %17 = arith.mulf %11, %11 : vector<4x1xf32>
    %18 = arith.subf %16, %17 : vector<4x1xf32>
    %cst_13 = arith.constant 9.99999974E-6 : f32
    %19 = vector.broadcast %cst_13 : f32 to vector<4x1xf32>
    %20 = arith.addf %18, %19 : vector<4x1xf32>
    %21 = math.rsqrt %20 : vector<4x1xf32>
    %22 = arith.mulf %21, %6 : vector<4x1xf32>
    %23 = vector.broadcast %11 : vector<4x1xf32> to vector<4x128xf32>
    %24 = arith.subf %5, %23 : vector<4x128xf32>
    %25 = vector.broadcast %22 : vector<4x1xf32> to vector<4x128xf32>
    %26 = arith.mulf %24, %25 : vector<4x128xf32>
    %27 = vector.broadcast %7 : vector<4x1xf32> to vector<4x128xf32>
    %28 = arith.addf %26, %27 : vector<4x128xf32>
    %cst_14 = arith.constant 0.000000e+00 : f32
    %29 = vector.broadcast %cst_14 : f32 to vector<4x128xf32>
    %30 = arith.maximumf %28, %29 : vector<4x128xf32>
    %cst_15 = arith.constant 0.000000e+00 : f32
    %31 = vector.broadcast %cst_15 : f32 to vector<4x9xf32>
    %c0_16 = arith.constant 0 : index
    %c0_17 = arith.constant 0 : index
    %32 = vector.load %arg18[%c0_16, %c0_17] : memref<4x146xf32, #tpu.memory_space<vmem>>, vector<4x9xf32>
    tpu.vector_store %arg18[%c0_16, %c0_17], %31 {strides = array<i32>} : memref<4x146xf32, #tpu.memory_space<vmem>>, vector<4x9xf32>,
    %c0_18 = arith.constant 0 : index
    %c137 = arith.constant 137 : index
    %33 = vector.load %arg18[%c0_18, %c137] : memref<4x146xf32, #tpu.memory_space<vmem>>, vector<4x9xf32>
    tpu.vector_store %arg18[%c0_18, %c137], %31 {strides = array<i32>} : memref<4x146xf32, #tpu.memory_space<vmem>>, vector<4x9xf32>,
    %c0_19 = arith.constant 0 : index
    %c9 = arith.constant 9 : index
    %34 = vector.load %arg18[%c0_19, %c9] : memref<4x146xf32, #tpu.memory_space<vmem>>, vector<4x128xf32>
    tpu.vector_store %arg18[%c0_19, %c9], %30 {strides = array<i32>} : memref<4x146xf32, #tpu.memory_space<vmem>>, vector<4x128xf32>,
    %c0_20 = arith.constant 0 : index
    %c0_21 = arith.constant 0 : index
    %35 = vector.load %arg1[%c0_20, %c0_21] : memref<9x128xf32, #tpu.memory_space<vmem>>, vector<9x128xf32>
    %c0_22 = arith.constant 0 : index
    %c0_23 = arith.constant 0 : index
    %36 = vector.load %arg18[%c0_22, %c0_23] : memref<4x146xf32, #tpu.memory_space<vmem>>, vector<4x128xf32>
    %37 = vector.extract_strided_slice %35 {offsets = [0, 0], sizes = [1, 128], strides = [1, 1]} : vector<9x128xf32> to vector<1x128xf32>
    %38 = vector.broadcast %37 : vector<1x128xf32> to vector<4x128xf32>
    %39 = arith.mulf %36, %38 : vector<4x128xf32>
    %c0_24 = arith.constant 0 : index
    %c0_25 = arith.constant 0 : index
    %40 = vector.load %arg19[%c0_24, %c0_25] : memref<36x128xf32, #tpu.memory_space<vmem>>, vector<4x128xf32>
    tpu.vector_store %arg19[%c0_24, %c0_25], %39 {strides = array<i32>} : memref<36x128xf32, #tpu.memory_space<vmem>>, vector<4x128xf32>,
    %c0_26 = arith.constant 0 : index
    %c1 = arith.constant 1 : index
    %41 = vector.load %arg18[%c0_26, %c1] : memref<4x146xf32, #tpu.memory_space<vmem>>, vector<4x128xf32>
    %42 = vector.extract_strided_slice %35 {offsets = [1, 0], sizes = [1, 128], strides = [1, 1]} : vector<9x128xf32> to vector<1x128xf32>
    %43 = vector.broadcast %42 : vector<1x128xf32> to vector<4x128xf32>
    %44 = arith.mulf %41, %43 : vector<4x128xf32>
    %c4 = arith.constant 4 : index
    %c0_27 = arith.constant 0 : index
    %45 = vector.load %arg19[%c4, %c0_27] : memref<36x128xf32, #tpu.memory_space<vmem>>, vector<4x128xf32>
    tpu.vector_store %arg19[%c4, %c0_27], %44 {strides = array<i32>} : memref<36x128xf32, #tpu.memory_space<vmem>>, vector<4x128xf32>,
    %c0_28 = arith.constant 0 : index
    %c2 = arith.constant 2 : index
    %46 = vector.load %arg18[%c0_28, %c2] : memref<4x146xf32, #tpu.memory_space<vmem>>, vector<4x128xf32>
    %47 = vector.extract_strided_slice %35 {offsets = [2, 0], sizes = [1, 128], strides = [1, 1]} : vector<9x128xf32> to vector<1x128xf32>
    %48 = vector.broadcast %47 : vector<1x128xf32> to vector<4x128xf32>
    %49 = arith.mulf %46, %48 : vector<4x128xf32>
    %c8 = arith.constant 8 : index
    %c0_29 = arith.constant 0 : index
    %50 = vector.load %arg19[%c8, %c0_29] : memref<36x128xf32, #tpu.memory_space<vmem>>, vector<4x128xf32>
    tpu.vector_store %arg19[%c8, %c0_29], %49 {strides = array<i32>} : memref<36x128xf32, #tpu.memory_space<vmem>>, vector<4x128xf32>,
    %c0_30 = arith.constant 0 : index
    %c8_31 = arith.constant 8 : index
    %51 = vector.load %arg18[%c0_30, %c8_31] : memref<4x146xf32, #tpu.memory_space<vmem>>, vector<4x128xf32>
    %52 = vector.extract_strided_slice %35 {offsets = [3, 0], sizes = [1, 128], strides = [1, 1]} : vector<9x128xf32> to vector<1x128xf32>
    %53 = vector.broadcast %52 : vector<1x128xf32> to vector<4x128xf32>
    %54 = arith.mulf %51, %53 : vector<4x128xf32>
    %c12 = arith.constant 12 : index
    %c0_32 = arith.constant 0 : index
    %55 = vector.load %arg19[%c12, %c0_32] : memref<36x128xf32, #tpu.memory_space<vmem>>, vector<4x128xf32>
    tpu.vector_store %arg19[%c12, %c0_32], %54 {strides = array<i32>} : memref<36x128xf32, #tpu.memory_space<vmem>>, vector<4x128xf32>,
    %c0_33 = arith.constant 0 : index
    %c9_34 = arith.constant 9 : index
    %56 = vector.load %arg18[%c0_33, %c9_34] : memref<4x146xf32, #tpu.memory_space<vmem>>, vector<4x128xf32>
    %57 = vector.extract_strided_slice %35 {offsets = [4, 0], sizes = [1, 128], strides = [1, 1]} : vector<9x128xf32> to vector<1x128xf32>
    %58 = vector.broadcast %57 : vector<1x128xf32> to vector<4x128xf32>
    %59 = arith.mulf %56, %58 : vector<4x128xf32>
    %c16 = arith.constant 16 : index
    %c0_35 = arith.constant 0 : index
    %60 = vector.load %arg19[%c16, %c0_35] : memref<36x128xf32, #tpu.memory_space<vmem>>, vector<4x128xf32>
    tpu.vector_store %arg19[%c16, %c0_35], %59 {strides = array<i32>} : memref<36x128xf32, #tpu.memory_space<vmem>>, vector<4x128xf32>,
    %c0_36 = arith.constant 0 : index
    %c10 = arith.constant 10 : index
    %61 = vector.load %arg18[%c0_36, %c10] : memref<4x146xf32, #tpu.memory_space<vmem>>, vector<4x128xf32>
    %62 = vector.extract_strided_slice %35 {offsets = [5, 0], sizes = [1, 128], strides = [1, 1]} : vector<9x128xf32> to vector<1x128xf32>
    %63 = vector.broadcast %62 : vector<1x128xf32> to vector<4x128xf32>
    %64 = arith.mulf %61, %63 : vector<4x128xf32>
    %c20 = arith.constant 20 : index
    %c0_37 = arith.constant 0 : index
    %65 = vector.load %arg19[%c20, %c0_37] : memref<36x128xf32, #tpu.memory_space<vmem>>, vector<4x128xf32>
    tpu.vector_store %arg19[%c20, %c0_37], %64 {strides = array<i32>} : memref<36x128xf32, #tpu.memory_space<vmem>>, vector<4x128xf32>,
    %c0_38 = arith.constant 0 : index
    %c16_39 = arith.constant 16 : index
    %66 = vector.load %arg18[%c0_38, %c16_39] : memref<4x146xf32, #tpu.memory_space<vmem>>, vector<4x128xf32>
    %67 = vector.extract_strided_slice %35 {offsets = [6, 0], sizes = [1, 128], strides = [1, 1]} : vector<9x128xf32> to vector<1x128xf32>
    %68 = vector.broadcast %67 : vector<1x128xf32> to vector<4x128xf32>
    %69 = arith.mulf %66, %68 : vector<4x128xf32>
    %c24 = arith.constant 24 : index
    %c0_40 = arith.constant 0 : index
    %70 = vector.load %arg19[%c24, %c0_40] : memref<36x128xf32, #tpu.memory_space<vmem>>, vector<4x128xf32>
    tpu.vector_store %arg19[%c24, %c0_40], %69 {strides = array<i32>} : memref<36x128xf32, #tpu.memory_space<vmem>>, vector<4x128xf32>,
    %c0_41 = arith.constant 0 : index
    %c17 = arith.constant 17 : index
    %71 = vector.load %arg18[%c0_41, %c17] : memref<4x146xf32, #tpu.memory_space<vmem>>, vector<4x128xf32>
    %72 = vector.extract_strided_slice %35 {offsets = [7, 0], sizes = [1, 128], strides = [1, 1]} : vector<9x128xf32> to vector<1x128xf32>
    %73 = vector.broadcast %72 : vector<1x128xf32> to vector<4x128xf32>
    %74 = arith.mulf %71, %73 : vector<4x128xf32>
    %c28 = arith.constant 28 : index
    %c0_42 = arith.constant 0 : index
    %75 = vector.load %arg19[%c28, %c0_42] : memref<36x128xf32, #tpu.memory_space<vmem>>, vector<4x128xf32>
    tpu.vector_store %arg19[%c28, %c0_42], %74 {strides = array<i32>} : memref<36x128xf32, #tpu.memory_space<vmem>>, vector<4x128xf32>,
    %c0_43 = arith.constant 0 : index
    %c18 = arith.constant 18 : index
    %76 = vector.load %arg18[%c0_43, %c18] : memref<4x146xf32, #tpu.memory_space<vmem>>, vector<4x128xf32>
    %77 = vector.extract_strided_slice %35 {offsets = [8, 0], sizes = [1, 128], strides = [1, 1]} : vector<9x128xf32> to vector<1x128xf32>
    %78 = vector.broadcast %77 : vector<1x128xf32> to vector<4x128xf32>
    %79 = arith.mulf %76, %78 : vector<4x128xf32>
    %c32 = arith.constant 32 : index
    %c0_44 = arith.constant 0 : index
    %80 = vector.load %arg19[%c32, %c0_44] : memref<36x128xf32, #tpu.memory_space<vmem>>, vector<4x128xf32>
    tpu.vector_store %arg19[%c32, %c0_44], %79 {strides = array<i32>} : memref<36x128xf32, #tpu.memory_space<vmem>>, vector<4x128xf32>,
    %c0_45 = arith.constant 0 : index
    %c0_46 = arith.constant 0 : index
    %81 = vector.load %arg7[%c0_45, %c0_46] : memref<4x36xf32, #tpu.memory_space<vmem>>, vector<4x36xf32>
    %c0_47 = arith.constant 0 : index
    %c0_48 = arith.constant 0 : index
    %82 = vector.load %arg19[%c0_47, %c0_48] : memref<36x128xf32, #tpu.memory_space<vmem>>, vector<36x128xf32>
    %cst_49 = arith.constant dense<0.000000e+00> : vector<4x128xf32>
    %83 = tpu.matmul %81, %82, %cst_49 {dimension_numbers = #tpu.dot_dimension_numbers<[1], [0], [0], [1], [0, 0, 1, 1], [], []>} : vector<4x36xf32>, vector<36x128xf32>, vector<4x128xf32> -> vector<4x128xf32>
    %c0_50 = arith.constant 0 : index
    %c0_51 = arith.constant 0 : index
    %84 = vector.load %arg8[%c0_50, %c0_51] : memref<4x1xf32, #tpu.memory_space<vmem>>, vector<4x1xf32>
    %85 = vector.broadcast %84 : vector<4x1xf32> to vector<4x128xf32>
    %86 = arith.addf %83, %85 : vector<4x128xf32>
    %c0_52 = arith.constant 0 : index
    %c0_53 = arith.constant 0 : index
    %87 = vector.load %arg9[%c0_52, %c0_53] : memref<4x1xf32, #tpu.memory_space<vmem>>, vector<4x1xf32>
    %c0_54 = arith.constant 0 : index
    %c0_55 = arith.constant 0 : index
    %88 = vector.load %arg10[%c0_54, %c0_55] : memref<4x1xf32, #tpu.memory_space<vmem>>, vector<4x1xf32>
    %cst_56 = arith.constant dense<0.000000e+00> : vector<4xf32>
    %89 = vector.multi_reduction <add>, %86, %cst_56 [1] : vector<4x128xf32> to vector<4xf32>
    %90 = vector.shape_cast %89 : vector<4xf32> to vector<4x1xf32>
    %cst_57 = arith.constant 7.812500e-03 : f32
    %91 = vector.broadcast %cst_57 : f32 to vector<4x1xf32>
    %92 = arith.mulf %90, %91 : vector<4x1xf32>
    %93 = arith.mulf %86, %86 : vector<4x128xf32>
    %cst_58 = arith.constant dense<0.000000e+00> : vector<4xf32>
    %94 = vector.multi_reduction <add>, %93, %cst_58 [1] : vector<4x128xf32> to vector<4xf32>
    %95 = vector.shape_cast %94 : vector<4xf32> to vector<4x1xf32>
    %cst_59 = arith.constant 7.812500e-03 : f32
    %96 = vector.broadcast %cst_59 : f32 to vector<4x1xf32>
    %97 = arith.mulf %95, %96 : vector<4x1xf32>
    %98 = arith.mulf %92, %92 : vector<4x1xf32>
    %99 = arith.subf %97, %98 : vector<4x1xf32>
    %cst_60 = arith.constant 9.99999974E-6 : f32
    %100 = vector.broadcast %cst_60 : f32 to vector<4x1xf32>
    %101 = arith.addf %99, %100 : vector<4x1xf32>
    %102 = math.rsqrt %101 : vector<4x1xf32>
    %103 = arith.mulf %102, %87 : vector<4x1xf32>
    %104 = vector.broadcast %92 : vector<4x1xf32> to vector<4x128xf32>
    %105 = arith.subf %86, %104 : vector<4x128xf32>
    %106 = vector.broadcast %103 : vector<4x1xf32> to vector<4x128xf32>
    %107 = arith.mulf %105, %106 : vector<4x128xf32>
    %108 = vector.broadcast %88 : vector<4x1xf32> to vector<4x128xf32>
    %109 = arith.addf %107, %108 : vector<4x128xf32>
    %cst_61 = arith.constant 0.000000e+00 : f32
    %110 = vector.broadcast %cst_61 : f32 to vector<4x128xf32>
    %111 = arith.maximumf %109, %110 : vector<4x128xf32>
    %c0_62 = arith.constant 0 : index
    %c0_63 = arith.constant 0 : index
    %112 = vector.load %arg11[%c0_62, %c0_63] : memref<16x4xf32, #tpu.memory_space<vmem>>, vector<16x4xf32>
    %cst_64 = arith.constant dense<0.000000e+00> : vector<16x128xf32>
    %113 = tpu.matmul %112, %111, %cst_64 {dimension_numbers = #tpu.dot_dimension_numbers<[1], [0], [0], [1], [0, 0, 1, 1], [], []>} : vector<16x4xf32>, vector<4x128xf32>, vector<16x128xf32> -> vector<16x128xf32>
    %c0_65 = arith.constant 0 : index
    %c0_66 = arith.constant 0 : index
    %114 = vector.load %arg12[%c0_65, %c0_66] : memref<16x1xf32, #tpu.memory_space<vmem>>, vector<16x1xf32>
    %115 = vector.broadcast %114 : vector<16x1xf32> to vector<16x128xf32>
    %116 = arith.addf %113, %115 : vector<16x128xf32>
    %c0_67 = arith.constant 0 : index
    %c0_68 = arith.constant 0 : index
    %117 = vector.load %arg13[%c0_67, %c0_68] : memref<16x1xf32, #tpu.memory_space<vmem>>, vector<16x1xf32>
    %c0_69 = arith.constant 0 : index
    %c0_70 = arith.constant 0 : index
    %118 = vector.load %arg14[%c0_69, %c0_70] : memref<16x1xf32, #tpu.memory_space<vmem>>, vector<16x1xf32>
    %cst_71 = arith.constant dense<0.000000e+00> : vector<16xf32>
    %119 = vector.multi_reduction <add>, %116, %cst_71 [1] : vector<16x128xf32> to vector<16xf32>
    %120 = vector.shape_cast %119 : vector<16xf32> to vector<16x1xf32>
    %cst_72 = arith.constant 7.812500e-03 : f32
    %121 = vector.broadcast %cst_72 : f32 to vector<16x1xf32>
    %122 = arith.mulf %120, %121 : vector<16x1xf32>
    %123 = arith.mulf %116, %116 : vector<16x128xf32>
    %cst_73 = arith.constant dense<0.000000e+00> : vector<16xf32>
    %124 = vector.multi_reduction <add>, %123, %cst_73 [1] : vector<16x128xf32> to vector<16xf32>
    %125 = vector.shape_cast %124 : vector<16xf32> to vector<16x1xf32>
    %cst_74 = arith.constant 7.812500e-03 : f32
    %126 = vector.broadcast %cst_74 : f32 to vector<16x1xf32>
    %127 = arith.mulf %125, %126 : vector<16x1xf32>
    %128 = arith.mulf %122, %122 : vector<16x1xf32>
    %129 = arith.subf %127, %128 : vector<16x1xf32>
    %cst_75 = arith.constant 9.99999974E-6 : f32
    %130 = vector.broadcast %cst_75 : f32 to vector<16x1xf32>
    %131 = arith.addf %129, %130 : vector<16x1xf32>
    %132 = math.rsqrt %131 : vector<16x1xf32>
    %133 = arith.mulf %132, %117 : vector<16x1xf32>
    %134 = vector.broadcast %122 : vector<16x1xf32> to vector<16x128xf32>
    %135 = arith.subf %116, %134 : vector<16x128xf32>
    %136 = vector.broadcast %133 : vector<16x1xf32> to vector<16x128xf32>
    %137 = arith.mulf %135, %136 : vector<16x128xf32>
    %138 = vector.broadcast %118 : vector<16x1xf32> to vector<16x128xf32>
    %139 = arith.addf %137, %138 : vector<16x128xf32>
    %c0_76 = arith.constant 0 : index
    %c0_77 = arith.constant 0 : index
    %140 = vector.load %arg15[%c0_76, %c0_77] : memref<1x16xf32, #tpu.memory_space<vmem>>, vector<1x16xf32>
    %cst_78 = arith.constant dense<0.000000e+00> : vector<1x128xf32>
    %141 = tpu.matmul %140, %139, %cst_78 {dimension_numbers = #tpu.dot_dimension_numbers<[1], [0], [0], [1], [0, 0, 1, 1], [], []>} : vector<1x16xf32>, vector<16x128xf32>, vector<1x128xf32> -> vector<1x128xf32>
    %c0_79 = arith.constant 0 : index
    %c0_80 = arith.constant 0 : index
    %142 = vector.load %arg2[%c0_79, %c0_80] : memref<2x128xf32, #tpu.memory_space<vmem>>, vector<2x128xf32>
    %c0_81 = arith.constant 0 : index
    %c0_82 = arith.constant 0 : index
    %143 = vector.load %arg16[%c0_81, %c0_82] : memref<16x1xf32, #tpu.memory_space<vmem>>, vector<16x1xf32>
    %cst_83 = arith.constant 0.000000e+00 : f32
    %144 = vector.broadcast %cst_83 : f32 to vector<16x128xf32>
    %145 = vector.extract_strided_slice %142 {offsets = [0, 0], sizes = [1, 128], strides = [1, 1]} : vector<2x128xf32> to vector<1x128xf32>
    %146 = arith.mulf %141, %145 : vector<1x128xf32>
    %cst_84 = arith.constant dense<0.000000e+00> : vector<1xf32>
    %147 = vector.multi_reduction <add>, %146, %cst_84 [1] : vector<1x128xf32> to vector<1xf32>
    %148 = vector.shape_cast %147 : vector<1xf32> to vector<1x1xf32>
    %cst_85 = arith.constant 1.562500e-02 : f32
    %149 = vector.broadcast %cst_85 : f32 to vector<1x1xf32>
    %150 = arith.mulf %148, %149 : vector<1x1xf32>
    %cst_86 = arith.constant 0.000000e+00 : f32
    %151 = vector.broadcast %cst_86 : f32 to vector<1x1xf32>
    %152 = arith.maximumf %150, %151 : vector<1x1xf32>
    %cst_87 = arith.constant 0.000000e+00 : f32
    %153 = vector.broadcast %cst_87 : f32 to vector<16x1xf32>
    %154 = vector.broadcast %152 : vector<1x1xf32> to vector<16x1xf32>
    %155 = arith.mulf %143, %154 : vector<16x1xf32>
    %156 = arith.addf %153, %155 : vector<16x1xf32>
    %157 = arith.negf %156 : vector<16x1xf32>
    %158 = math.exp %157 : vector<16x1xf32>
    %cst_88 = arith.constant 1.000000e+00 : f32
    %159 = vector.broadcast %cst_88 : f32 to vector<16x1xf32>
    %160 = arith.addf %159, %158 : vector<16x1xf32>
    %161 = arith.divf %159, %160 : vector<16x1xf32>
    %162 = vector.broadcast %161 : vector<16x1xf32> to vector<16x128xf32>
    %163 = vector.broadcast %145 : vector<1x128xf32> to vector<16x128xf32>
    %164 = arith.mulf %162, %163 : vector<16x128xf32>
    %165 = arith.addf %144, %164 : vector<16x128xf32>
    %166 = vector.extract_strided_slice %142 {offsets = [1, 0], sizes = [1, 128], strides = [1, 1]} : vector<2x128xf32> to vector<1x128xf32>
    %167 = arith.mulf %141, %166 : vector<1x128xf32>
    %cst_89 = arith.constant dense<0.000000e+00> : vector<1xf32>
    %168 = vector.multi_reduction <add>, %167, %cst_89 [1] : vector<1x128xf32> to vector<1xf32>
    %169 = vector.shape_cast %168 : vector<1xf32> to vector<1x1xf32>
    %cst_90 = arith.constant 1.562500e-02 : f32
    %170 = vector.broadcast %cst_90 : f32 to vector<1x1xf32>
    %171 = arith.mulf %169, %170 : vector<1x1xf32>
    %cst_91 = arith.constant 0.000000e+00 : f32
    %172 = vector.broadcast %cst_91 : f32 to vector<1x1xf32>
    %173 = arith.maximumf %171, %172 : vector<1x1xf32>
    %cst_92 = arith.constant 0.000000e+00 : f32
    %174 = vector.broadcast %cst_92 : f32 to vector<16x1xf32>
    %175 = vector.broadcast %173 : vector<1x1xf32> to vector<16x1xf32>
    %176 = arith.mulf %143, %175 : vector<16x1xf32>
    %177 = arith.addf %174, %176 : vector<16x1xf32>
    %178 = arith.negf %177 : vector<16x1xf32>
    %179 = math.exp %178 : vector<16x1xf32>
    %cst_93 = arith.constant 1.000000e+00 : f32
    %180 = vector.broadcast %cst_93 : f32 to vector<16x1xf32>
    %181 = arith.addf %180, %179 : vector<16x1xf32>
    %182 = arith.divf %180, %181 : vector<16x1xf32>
    %183 = vector.broadcast %182 : vector<16x1xf32> to vector<16x128xf32>
    %184 = vector.broadcast %166 : vector<1x128xf32> to vector<16x128xf32>
    %185 = arith.mulf %183, %184 : vector<16x128xf32>
    %186 = arith.addf %165, %185 : vector<16x128xf32>
    %187 = arith.mulf %139, %186 : vector<16x128xf32>
    %188 = arith.addf %187, %0 : vector<16x128xf32>
    %cst_94 = arith.constant 0.000000e+00 : f32
    %189 = vector.broadcast %cst_94 : f32 to vector<16x128xf32>
    %190 = arith.maximumf %188, %189 : vector<16x128xf32>
    %c0_95 = arith.constant 0 : index
    %c0_96 = arith.constant 0 : index
    %191 = vector.load %arg17[%c0_95, %c0_96] : memref<16x128xf32, #tpu.memory_space<vmem>>, vector<16x128xf32>
    tpu.vector_store %arg17[%c0_95, %c0_96], %190 {strides = array<i32>} : memref<16x128xf32, #tpu.memory_space<vmem>>, vector<16x128xf32>,
    return
  }
}

</mosaic_0001>

<bundles_post_ra>
// kernel: resnet_se_block.1
= control target key start
LH: loop header
LB: loop body
LE: loop exit
PB: predicated region body
PF: predicated region fallthrough
CT: control target
= control target key end

     0   :  { %v749_v2 = vmov 0   ;;  %vm65_vm0 = vcmask 130048   ;;  %vm91_vm1 = vcmask 1043456   ;;  %s750_s23 = smov 9   ;;  %s751_s24 = smov 16   ;;  %vm129_vm5 = vcmask 68608   ;;  %s992_s0 = inlined_call_operand.vmem [shape: f32[16,128], index: 0, kind: input, shape index: {}]   ;;  %s993_s3 = inlined_call_operand.vmem [shape: f32[4,16], index: 3, kind: input, shape index: {}]   ;;  %s994_s4 = inlined_call_operand.vmem [shape: f32[4,1], index: 4, kind: input, shape index: {}]   ;;  %s995_s1 = inlined_call_operand.vmem [shape: f32[9,128], index: 1, kind: input, shape index: {}]   ;;  %s996_s6 = inlined_call_operand.vmem [shape: f32[4,1], index: 6, kind: input, shape index: {}]   ;;  %s997_s5 = inlined_call_operand.vmem [shape: f32[4,1], index: 5, kind: input, shape index: {}]   ;;  %s998_s8 = inlined_call_operand.vmem [shape: f32[4,1], index: 8, kind: input, shape index: {}]   ;;  %s999_s7 = inlined_call_operand.vmem [shape: f32[4,36], index: 7, kind: input, shape index: {}]   ;;  %s1000_s9 = inlined_call_operand.vmem [shape: f32[4,1], index: 9, kind: input, shape index: {}]   ;;  %s1001_s10 = inlined_call_operand.vmem [shape: f32[4,1], index: 10, kind: input, shape index: {}]   ;;  %s1002_s12 = inlined_call_operand.vmem [shape: f32[16,1], index: 12, kind: input, shape index: {}]   ;;  %s1003_s11 = inlined_call_operand.vmem [shape: f32[16,4], index: 11, kind: input, shape index: {}]   ;;  %s1004_s14 = inlined_call_operand.vmem [shape: f32[16,1], index: 14, kind: input, shape index: {}]   ;;  %s1005_s13 = inlined_call_operand.vmem [shape: f32[16,1], index: 13, kind: input, shape index: {}]   ;;  %s1006_s15 = inlined_call_operand.vmem [shape: f32[1,16], index: 15, kind: input, shape index: {}]   ;;  %s1007_s2 = inlined_call_operand.vmem [shape: f32[2,128], index: 2, kind: input, shape index: {}]   ;;  %s1008_s16 = inlined_call_operand.vmem [shape: f32[16,1], index: 16, kind: input, shape index: {}]   ;;  %s1009_s17 = inlined_call_operand.vmem [shape: f32[16,128], index: 17, kind: output, shape index: {}]  }
   0x1   :  { %1011 = sst [smem:[#allocation4_spill]] %s992_s0  ;;  %721 = vset.pattern.permute.xlu0 %v749_v2  ;;  %722 = vset.pattern.permute.xlu1 %v749_v2  ;;  %v59_v4 = vld [vmem:[%s994_s4] sm:$0xf]  ;;  %v724_v31 = vld [vmem:[%s995_s1 + $0x8] ss:$0 sm:$0xff]  ;;  %s753_s27 = smov 1  }
   0x2   :  { %1012 = sst [smem:[#allocation5_spill]] %s993_s3  ;;  %723 = vset.pattern.permute.xlu2 %v749_v2  ;;  %62 = vperm.xlu0 %721, %v59_v4   ;;  %v90_v11 = vld [vmem:[%s996_s6] sm:$0xf]  ;;  %vm131_vm6 = vcmask 142408   ;;  %v754_v39 = vmov 0.0   ;;  %s755_s28 = smov 2  }
   0x3   :  { %s1013_s26 = sld [smem:[#allocation4_spill]]  ;;  %124 = vperm.xlu2 %723, %v90_v11   ;;  %v89_v24 = vld [vmem:[%s997_s5] sm:$0xf]  ;;  %s752_s5 = smov 18   ;;  %130 = vst.msk [vmem:[#allocation2] sm:$0xf] %vm129_vm5, %v754_v39 }
   0x4   :  { %s1014_s30 = sld [smem:[#allocation5_spill]]  ;;  %v144_v28 = vld [vmem:[%s995_s1] sm:$0xff]  ;;  %132 = vst.msk [vmem:[#allocation2 + $0x4] sm:$0xf] %vm131_vm6, %v754_v39  ;;  %s756_s1 = smov 8   ;;  %vm140_vm7 = vcmask 1043528  }
   0x5   :  { %v217_v29 = vperm.slane %v144_v28, 4  ;;  %v260_v30 = vperm.slane %v144_v28, 6  ;;  %v151_v38 = vperm.slane %v144_v28, 1  ;;  %v173_v40 = vperm.slane %v144_v28, 2  ;;  %s757_s29 = smov 10   ;;  %s758_s0 = smov 17  }
   0x6   :  { %v195_v41 = vperm.slane %v144_v28, 3  ;;  %v238_v42 = vperm.slane %v144_v28, 5  ;;  %v281_v43 = vperm.slane %v144_v28, 7  ;;  %vm141_vm8 = vcmask 72708   ;;  %s760_s18 = smov 120   ;;  %s761_s19 = smov 119  }
   0x7   :  { %vm137_vm9 = vcmask 72704   ;;  %vm142_vm10 = vmor %vm141_vm8, %vm140_vm7  ;;  %vm156_vm11 = vcmask 7168   ;;  %v147_v49 = vperm.slane %v144_v28, 0  ;;  %vm178_vm12 = vcmask 15360   ;;  %s762_s3 = smov 118   ;;  %s763_s20 = smov 112  }
   0x8   :  { %vm200_vm13 = vcmask 64512   ;;  %vm243_vm14 = vcmask 80896   ;;  %vm286_vm15 = vcmask 138240   ;;  %s764_s4 = smov 111   ;;  %s765_s21 = smov 110   ;;  %vm255_vm5 = vcmask 965632  }
   0x9   :  { %v860_v0 = vld [vmem:[%s1013_s26 + $0x8] sm:$0xff]  ;;  %v865_v1 = vld [vmem:[%s1013_s26] sm:$0xff]  ;;  %vm276_vm6 = vcmask 916480   ;;  %vm298_vm7 = vcmask 908288   ;;  %vm212_vm8 = vcmask 982016  }
   0xa   :  { %83 = vmatpush.msra.mxu0 %v860_v0  ;;  %v58_v3 = vld [vmem:[%s1014_s30] sm:$0xf]  ;;  %s759_s30 = smov 126  }
   0xc   :  { %84 = vmatpush.msra.mxu0 %v865_v1 }
   0xd   :  { %692 = vmatmul.msk.f32.vlgmr.msra.gmra.mxu0 %vm65_vm0, %v58_v3 }
  0x5d   :  { %v125_v34 = vpop.permute.xlu2 %124 }
  0x74   :  { %v63_v5 = vpop.permute.xlu0 %62 }
  0x8a   :  { %v86_v6 = vpop.f32.mrf.mxu0 }
  0x8b   :  { %v87_v7 = vadd.f32 %v86_v6, %v63_v5 }
  0x8d   :  { %v92_v8 = vsel %vm91_vm1, %v87_v7, 0.0  ;;  %v96_v9 = vmul.f32 %v87_v7, %v87_v7 }
  0x8e   :  { %93 = vadd.xlane.f32.xlu0 %v92_v8 }
  0x8f   :  { %v97_v10 = vsel %vm91_vm1, %v96_v9, 0.0 }
  0x90   :  { %98 = vadd.xlane.f32.xlu1 %v97_v10 }
 0x101   :  { %v94_v12 = vpop.xlane.xlu0 %93 }
 0x102   :  { %v95_v13 = vmul.f32 0.0078125, %v94_v12 }
 0x103   :  { %v99_v14 = vpop.xlane.xlu1 %98 }
 0x104   :  { %v101_v15 = vmul.f32 %v95_v13, %v95_v13  ;;  %v100_v16 = vmul.f32 0.0078125, %v99_v14  ;;  %v115_v32 = vsub.f32 %v87_v7, %v95_v13 }
 0x106   :  { %v102_v17 = vsub.f32 %v100_v16, %v101_v15 }
 0x108   :  { %v103_v18 = vadd.f32 1e-05, %v102_v17 }
 0x10a   :  { %725 = vrsqrt.f32 %v103_v18  ;;  %vm110_vm3 = vweird.f32 %v103_v18 }
 0x110   :  { %v726_v19 = vpop.eup %725 }
 0x111   :  { %v105_v20 = vmul.f32 %v726_v19, %v103_v18  ;;  %vm111_vm2 = vweird.f32 %v726_v19 }
 0x112   :  { %vm112_vm4 = vmor %vm110_vm3, %vm111_vm2  ;;  %vm308_vm2 = vcmask 146432   ;;  %vm190_vm3 = vcmask 1031168  }
 0x113   :  { %v106_v21 = vmul.f32 %v726_v19, %v105_v20 }
 0x115   :  { %v107_v22 = vmul.f32 0.5, %v106_v21 }
 0x117   :  { %v108_v23 = vsub.f32 1.5, %v107_v22 }
 0x119   :  { %v109_v25 = vmul.f32 %v726_v19, %v108_v23 }
 0x11b   :  { %v113_v26 = vsel %vm112_vm4, %v726_v19, %v109_v25  ;;  %vm233_vm4 = vcmask 973824  }
 0x11c   :  { %v114_v27 = vmul.f32 %v113_v26, %v89_v24 }
 0x11e   :  { %118 = vperm.xlu1 %722, %v114_v27  }
 0x126   :  { %219 = vrot.lane.b32.xlu1 %v217_v29, %s750_s23 }
 0x12e   :  { %262 = vrot.lane.b32.xlu1 %v260_v30, %s751_s24 }
 0x136   :  { %305 = vrot.lane.b32.xlu1 %v724_v31, %s752_s5 }
 0x190   :  { %v119_v33 = vpop.permute.xlu1 %118 }
 0x191   :  { %v121_v35 = vmul.f32 %v119_v33, %v115_v32 }
 0x193   :  { %v127_v36 = vadd.f32 %v125_v34, %v121_v35 }
 0x195   :  { %v128_v37 = vmax.f32 %v127_v36, 0.0 }
 0x197   :  { %134 = vrot.lane.b32.xlu2 %v128_v37, %s750_s23  ;;  %v330_v37 = vld [vmem:[%s998_s8] sm:$0xf]  ;;  %s766_s23 = smov 127  }
 0x198   :  { %v220_v63 = vpop.permute.xlu1 %219 }
 0x199   :  { %v221_v3 = vrot.slane %v220_v63, 4 }
 0x19b   :  { %v222_v7 = vsel %vm137_vm9, %v221_v3, %v220_v63 }
 0x19f   :  { %153 = vrot.lane.b32.xlu2 %v151_v38, %s753_s27 }
 0x1a0   :  { %v263_v14 = vpop.permute.xlu1 %262 }
 0x1a1   :  { %v264_v15 = vrot.slane %v263_v14, 4 }
 0x1a3   :  { %v265_v19 = vsel %vm65_vm0, %v264_v15, %v263_v14 }
 0x1a7   :  { %175 = vrot.lane.b32.xlu2 %v173_v40, %s755_s28 }
 0x1a8   :  { %v306_v25 = vpop.permute.xlu1 %305 }
 0x1a9   :  { %v307_v27 = vrot.slane %v306_v25, 4 }
 0x1ab   :  { %v309_v31 = vsel %vm308_vm2, %v307_v27, %v306_v25 }
 0x1af   :  { %197 = vrot.lane.b32.xlu2 %v195_v41, %s756_s1 }
 0x1b7   :  { %240 = vrot.lane.b32.xlu2 %v238_v42, %s757_s29 }
 0x1bf   :  { %283 = vrot.lane.b32.xlu2 %v281_v43, %s758_s0 }
 0x1f1   :  { %v135_v44 = vpop.permute.xlu2 %134 }
 0x1f2   :  { %v136_v45 = vrot.slane %v135_v44, 4 }
 0x1f4   :  { %v138_v46 = vsel %vm137_vm9, %v136_v45, %v135_v44  ;;  %vm320_vm9 = vcmask 900096  }
 0x1f5   :  { %143 = vst.msk [vmem:[#allocation2] sm:$0xff] %vm142_vm10, %v138_v46  ;;  %vm168_vm10 = vcmask 1039360  }
 0x1f9   :  { %v154_v47 = vpop.permute.xlu2 %153 }
 0x1fa   :  { %v155_v48 = vrot.slane %v154_v47, 4 }
 0x1fc   :  { %v891_v50 = vld [vmem:[#allocation2] sm:$0xff]  ;;  %v157_v51 = vsel %vm156_vm11, %v155_v48, %v154_v47  ;;  %vm336_vm11 = vcmask 293888  }
 0x1fd   :  { %v146_v52 = vld [vmem:[#allocation2] sm:$0xf]  ;;  %v159_v53 = vmul.f32 %v891_v50, %v157_v51  ;;  %v224_v9 = vmul.f32 %v222_v7, %v891_v50  ;;  %v267_v21 = vmul.f32 %v265_v19, %v891_v50  ;;  %v311_v32 = vmul.f32 %v309_v31, %v891_v50 }
 0x1fe   :  { %v148_v54 = vmul.f32 %v147_v49, %v146_v52 }
 0x1ff   :  { %161 = vst [vmem:[#allocation1] ss:$2 sm:$0xff] %v159_v53 }
 0x200   :  { %149 = vst [vmem:[#allocation3] sm:$0xf] %v148_v54 }
 0x201   :  { %v176_v55 = vpop.permute.xlu2 %175 }
 0x202   :  { %v177_v56 = vrot.slane %v176_v55, 4 }
 0x204   :  { %v179_v57 = vsel %vm178_vm12, %v177_v56, %v176_v55 }
 0x205   :  { %v181_v58 = vmul.f32 %v891_v50, %v179_v57 }
 0x206   :  { %v895_v59 = vld.sshfl [vmem:[#allocation1] sm:$0xff pattern:$0x75316420]  ;;  %v897_v60 = vld.sshfl [vmem:[#allocation1 + $0x8] sm:$0xff pattern:$0x75316420] }
 0x207   :  { %183 = vst [vmem:[#allocation1] ss:$2 sm:$0xff] %v181_v58 }
 0x209   :  { %v198_v61 = vpop.permute.xlu2 %197 }
 0x20a   :  { %v199_v62 = vrot.slane %v198_v61, 4 }
 0x20c   :  { %v201_v2 = vsel %vm200_vm13, %v199_v62, %v198_v61 }
 0x20d   :  { %v203_v4 = vmul.f32 %v891_v50, %v201_v2 }
 0x20e   :  { %v185_v5 = vld.sshfl [vmem:[#allocation1 + $0x8] sm:$0xff pattern:$0x75316420]  ;;  %v184_v6 = vld.sshfl [vmem:[#allocation1] sm:$0xff pattern:$0x75316420] }
 0x20f   :  { %188 = vrot.lane.b32.xlu0 %v185_v5, %s759_s30  ;;  %186 = vrot.lane.b32.xlu1 %v184_v6, %s759_s30  ;;  %205 = vst [vmem:[#allocation1] ss:$2 sm:$0xff] %v203_v4  ;;  %v324_v4 = vld [vmem:[%s999_s7] sm:$0xf] }
 0x211   :  { %v241_v8 = vpop.permute.xlu2 %240 }
 0x212   :  { %v242_v10 = vrot.slane %v241_v8, 4 }
 0x214   :  { %v244_v13 = vsel %vm243_vm14, %v242_v10, %v241_v8 }
 0x215   :  { %v246_v16 = vmul.f32 %v244_v13, %v891_v50 }
 0x216   :  { %v206_v11 = vld.sshfl [vmem:[#allocation1] sm:$0xff pattern:$0x75316420]  ;;  %v207_v12 = vld.sshfl [vmem:[#allocation1 + $0x8] sm:$0xff pattern:$0x75316420] }
 0x217   :  { %208 = vrot.lane.b32.xlu2 %v206_v11, %s760_s18  ;;  %226 = vst [vmem:[#allocation1] ss:$2 sm:$0xff] %v224_v9 }
 0x219   :  { %v284_v20 = vpop.permute.xlu2 %283 }
 0x21a   :  { %v285_v22 = vrot.slane %v284_v20, 4 }
 0x21c   :  { %v287_v26 = vsel %vm286_vm15, %v285_v22, %v284_v20  ;;  %vm416_vm15 = vcmask 31744  }
 0x21d   :  { %v289_v28 = vmul.f32 %v287_v26, %v891_v50 }
 0x21e   :  { %v228_v17 = vld.sshfl [vmem:[#allocation1 + $0x8] sm:$0xff pattern:$0x75316420]  ;;  %v227_v18 = vld.sshfl [vmem:[#allocation1] sm:$0xff pattern:$0x75316420] }
 0x21f   :  { %231 = vrot.lane.b32.xlu1 %v228_v17, %s761_s19  ;;  %229 = vrot.lane.b32.xlu2 %v227_v18, %s761_s19  ;;  %248 = vst [vmem:[#allocation1] ss:$2 sm:$0xff] %v246_v16 }
 0x226   :  { %v250_v23 = vld.sshfl [vmem:[#allocation1 + $0x8] sm:$0xff pattern:$0x75316420]  ;;  %v249_v24 = vld.sshfl [vmem:[#allocation1] sm:$0xff pattern:$0x75316420] }
 0x227   :  { %253 = vrot.lane.b32.xlu2 %v250_v23, %s762_s3  ;;  %251 = vrot.lane.b32.xlu0 %v249_v24, %s762_s3  ;;  %269 = vst [vmem:[#allocation1] ss:$2 sm:$0xff] %v267_v21  ;;  %v363_v24 = vld [vmem:[%s1000_s9] sm:$0xf] }
 0x22e   :  { %v271_v29 = vld.sshfl [vmem:[#allocation1 + $0x8] sm:$0xff pattern:$0x75316420]  ;;  %v270_v30 = vld.sshfl [vmem:[#allocation1] sm:$0xff pattern:$0x75316420] }
 0x22f   :  { %274 = vrot.lane.b32.xlu2 %v271_v29, %s763_s20  ;;  %272 = vrot.lane.b32.xlu1 %v270_v30, %s763_s20  ;;  %291 = vst [vmem:[#allocation1] ss:$2 sm:$0xff] %v289_v28  ;;  %v364_v28 = vld [vmem:[%s1001_s10] sm:$0xf]  ;;  %v405_v29 = vld [vmem:[%s1002_s12 + $0x8] sm:$0xff] }
 0x230   :  { %v404_v30 = vld [vmem:[%s1002_s12] sm:$0xff] }
 0x236   :  { %v293_v33 = vld.sshfl [vmem:[#allocation1 + $0x8] sm:$0xff pattern:$0x75316420]  ;;  %v292_v34 = vld.sshfl [vmem:[#allocation1] sm:$0xff pattern:$0x75316420] }
 0x237   :  { %296 = vrot.lane.b32.xlu0 %v293_v33, %s764_s4  ;;  %294 = vrot.lane.b32.xlu1 %v292_v34, %s764_s4  ;;  %313 = vst [vmem:[#allocation1] ss:$2 sm:$0xff] %v311_v32 }
 0x23e   :  { %v315_v35 = vld.sshfl [vmem:[#allocation1 + $0x8] sm:$0xff pattern:$0x75316420]  ;;  %v314_v36 = vld.sshfl [vmem:[#allocation1] sm:$0xff pattern:$0x75316420] }
 0x23f   :  { %210 = vrot.lane.b32.xlu1 %v207_v12, %s760_s18  ;;  %318 = vrot.lane.b32.xlu2 %v315_v35, %s765_s21 }
 0x240   :  { %316 = vrot.lane.b32.xlu0 %v314_v36, %s765_s21 }
 0x247   :  { %333 = vperm.xlu1 %722, %v330_v37   ;;  %166 = vrot.lane.b32.xlu2 %v897_v60, %s766_s23  ;;  %v402_v37 = vld [vmem:[%s1003_s11] sm:$0xff] }
 0x248   :  { %164 = vrot.lane.b32.xlu0 %v895_v59, %s766_s23 }
 0x271   :  { %v209_v40 = vpop.permute.xlu2 %208 }
 0x279   :  { %v230_v42 = vpop.permute.xlu2 %229 }
 0x281   :  { %v189_v38 = vpop.permute.xlu0 %188  ;;  %v187_v39 = vpop.permute.xlu1 %186 }
 0x282   :  { %v191_v41 = vsel %vm190_vm3, %v187_v39, %v189_v38  ;;  %v254_v45 = vpop.permute.xlu2 %253  ;;  %v403_v38 = vld [vmem:[%s1003_s11 + $0x8] sm:$0xff] }
 0x283   :  { %193 = vst [vmem:[#allocation3 + $0x8] sm:$0xf] %v191_v41 }
 0x28a   :  { %v275_v48 = vpop.permute.xlu2 %274 }
 0x291   :  { %v232_v43 = vpop.permute.xlu1 %231 }
 0x292   :  { %v234_v44 = vsel %vm233_vm4, %v230_v42, %v232_v43 }
 0x293   :  { %236 = vst [vmem:[#allocation3 + $0x10] sm:$0xf] %v234_v44 }
 0x299   :  { %v252_v46 = vpop.permute.xlu0 %251  ;;  %v319_v54 = vpop.permute.xlu2 %318 }
 0x29a   :  { %v256_v47 = vsel %vm255_vm5, %v252_v46, %v254_v45 }
 0x29b   :  { %258 = vst [vmem:[#allocation3 + $0x14] sm:$0xf] %v256_v47  ;;  %v451_v47 = vld [vmem:[%s1004_s14] sm:$0xff] }
 0x2a1   :  { %v273_v49 = vpop.permute.xlu1 %272  ;;  %v167_v59 = vpop.permute.xlu2 %166 }
 0x2a2   :  { %v277_v50 = vsel %vm276_vm6, %v273_v49, %v275_v48  ;;  %v327_v2 = vld [vmem:[#allocation3 + $0x10] sm:$0xff] }
 0x2a3   :  { %279 = vst [vmem:[#allocation3 + $0x18] sm:$0xf] %v277_v50 }
 0x2a9   :  { %v297_v51 = vpop.permute.xlu0 %296  ;;  %v295_v52 = vpop.permute.xlu1 %294 }
 0x2aa   :  { %v299_v53 = vsel %vm298_vm7, %v295_v52, %v297_v51  ;;  %vm549_vm7 = vcmask 1040384  }
 0x2ab   :  { %301 = vst [vmem:[#allocation3 + $0x1c] sm:$0xf] %v299_v53 }
 0x2b1   :  { %v211_v55 = vpop.permute.xlu1 %210 }
 0x2b2   :  { %v317_v56 = vpop.permute.xlu0 %316  ;;  %v213_v57 = vsel %vm212_vm8, %v209_v40, %v211_v55  ;;  %v328_v63 = vld [vmem:[#allocation3 + $0x18] sm:$0xff] }
 0x2b3   :  { %v321_v58 = vsel %vm320_vm9, %v317_v56, %v319_v54  ;;  %215 = vst [vmem:[#allocation3 + $0xc] sm:$0xf] %v213_v57 }
 0x2b4   :  { %323 = vst [vmem:[#allocation3 + $0x20] sm:$0xf] %v321_v58 }
 0x2b9   :  { %v334_v6 = vpop.permute.xlu1 %333 }
 0x2ba   :  { %v165_v60 = vpop.permute.xlu0 %164  ;;  %v326_v3 = vld [vmem:[#allocation3 + $0x8] sm:$0xff] }
 0x2bb   :  { %v169_v61 = vsel %vm168_vm10, %v165_v60, %v167_v59  ;;  %v329_v62 = vld [vmem:[#allocation3 + $0x20] sm:$0xf] }
 0x2bc   :  { %171 = vst [vmem:[#allocation3 + $0x4] sm:$0xf] %v169_v61  ;;  %693 = vmatpush.msk.msra.mxu1 %vm91_vm1, %v329_v62 }
 0x2be   :  { %355 = vmatpush.msra.mxu1 %v328_v63 }
 0x2c0   :  { %356 = vmatpush.msra.mxu1 %v327_v2 }
 0x2c2   :  { %357 = vmatpush.msra.mxu1 %v326_v3 }
 0x2c3   :  { %v325_v5 = vld [vmem:[#allocation3] sm:$0xff] }
 0x2c4   :  { %358 = vmatpush.msra.mxu1 %v325_v5 }
 0x2c5   :  { %694 = vmatmul.msk.f32.vlgmr.msra.gmra.mxu1 %vm336_vm11, %v324_v4 }
 0x342   :  { %v360_v7 = vpop.f32.mrf.mxu1 }
 0x343   :  { %v361_v8 = vadd.f32 %v360_v7, %v334_v6 }
 0x345   :  { %v365_v9 = vsel %vm91_vm1, %v361_v8, 0.0  ;;  %v369_v10 = vmul.f32 %v361_v8, %v361_v8 }
 0x346   :  { %366 = vadd.xlane.f32.xlu0 %v365_v9 }
 0x347   :  { %v370_v11 = vsel %vm91_vm1, %v369_v10, 0.0  ;;  %v449_v10 = vld [vmem:[%s1005_s13] sm:$0xff] }
 0x348   :  { %371 = vadd.xlane.f32.xlu2 %v370_v11 }
 0x3b9   :  { %v367_v12 = vpop.xlane.xlu0 %366 }
 0x3ba   :  { %v368_v13 = vmul.f32 0.0078125, %v367_v12 }
 0x3bb   :  { %v372_v14 = vpop.xlane.xlu2 %371 }
 0x3bc   :  { %v374_v15 = vmul.f32 %v368_v13, %v368_v13  ;;  %v373_v16 = vmul.f32 0.0078125, %v372_v14  ;;  %v388_v32 = vsub.f32 %v361_v8, %v368_v13  ;;  %v450_v13 = vld [vmem:[%s1005_s13 + $0x8] sm:$0xff] }
 0x3be   :  { %v375_v17 = vsub.f32 %v373_v16, %v374_v15 }
 0x3c0   :  { %v376_v18 = vadd.f32 1e-05, %v375_v17 }
 0x3c2   :  { %727 = vrsqrt.f32 %v376_v18  ;;  %vm383_vm13 = vweird.f32 %v376_v18 }
 0x3c8   :  { %v728_v19 = vpop.eup %727 }
 0x3c9   :  { %v378_v20 = vmul.f32 %v728_v19, %v376_v18  ;;  %vm384_vm12 = vweird.f32 %v728_v19  ;;  %v452_v18 = vld [vmem:[%s1004_s14 + $0x8] sm:$0xff] }
 0x3ca   :  { %vm385_vm14 = vmor %vm383_vm13, %vm384_vm12 }
 0x3cb   :  { %v379_v21 = vmul.f32 %v728_v19, %v378_v20 }
 0x3cd   :  { %v380_v22 = vmul.f32 0.5, %v379_v21 }
 0x3cf   :  { %v381_v23 = vsub.f32 1.5, %v380_v22 }
 0x3d1   :  { %v382_v25 = vmul.f32 %v728_v19, %v381_v23 }
 0x3d3   :  { %v386_v26 = vsel %vm385_vm14, %v728_v19, %v382_v25 }
 0x3d4   :  { %v387_v27 = vmul.f32 %v386_v26, %v363_v24 }
 0x3d6   :  { %391 = vperm.xlu1 %722, %v387_v27  }
 0x3de   :  { %397 = vperm.xlu1 %722, %v364_v28  }
 0x3e6   :  { %413 = vperm.xlu1 %722, %v405_v29   ;;  %v521_v29 = vld [vmem:[%s1006_s15] sm:$0x1] }
 0x3ee   :  { %408 = vperm.xlu1 %722, %v404_v30   ;;  %v970_v30 = vld [vmem:[%s1007_s2] sm:$0x3] }
 0x448   :  { %v392_v31 = vpop.permute.xlu1 %391 }
 0x449   :  { %v394_v33 = vmul.f32 %v392_v31, %v388_v32  ;;  %v614_v31 = vrot.slane %v970_v30, 1 }
 0x450   :  { %v398_v34 = vpop.permute.xlu1 %397 }
 0x451   :  { %v400_v35 = vadd.f32 %v398_v34, %v394_v33 }
 0x453   :  { %v401_v36 = vmax.f32 %v400_v35, 0.0 }
 0x455   :  { %695 = vmatpush.msk.msra.mxu2 %vm91_vm1, %v401_v36 }
 0x456   :  { %696 = vmatmul.msk.f32.vlgmr.msra.gmra.mxu2 %vm416_vm15, %v402_v37 }
 0x458   :  { %v414_v39 = vpop.permute.xlu1 %413 }
 0x45e   :  { %697 = vmatmul.msk.f32.gmra.mxu2 %vm416_vm15, %v403_v38 }
 0x460   :  { %v409_v40 = vpop.permute.xlu1 %408 }
 0x4d9   :  { %v443_v41 = vpop.f32.mrf.mxu2 }
 0x4da   :  { %v939_v42 = vadd.f32 %v443_v41, %v409_v40 }
 0x4dc   :  { %453 = vadd.xlane.f32.xlu0 %v939_v42  ;;  %v459_v45 = vmul.f32 %v939_v42, %v939_v42 }
 0x4e1   :  { %v446_v43 = vpop.f32.mrf.mxu2 }
 0x4e2   :  { %v447_v44 = vadd.f32 %v446_v43, %v414_v39  ;;  %v546_v43 = vld [vmem:[%s1008_s16] sm:$0xff] }
 0x4e4   :  { %455 = vadd.xlane.f32.xlu1 %v447_v44  ;;  %461 = vadd.xlane.f32.xlu0 %v459_v45  ;;  %v460_v46 = vmul.f32 %v447_v44, %v447_v44 }
 0x4e6   :  { %463 = vadd.xlane.f32.xlu2 %v460_v46 }
 0x4fd   :  { %511 = vperm.xlu1 %722, %v451_v47  }
 0x54f   :  { %v454_v48 = vpop.xlane.xlu0 %453 }
 0x550   :  { %v457_v49 = vmul.f32 0.0078125, %v454_v48 }
 0x552   :  { %v467_v52 = vmul.f32 %v457_v49, %v457_v49  ;;  %v495_v24 = vsub.f32 %v939_v42, %v457_v49 }
 0x557   :  { %v462_v50 = vpop.xlane.xlu0 %461  ;;  %v456_v51 = vpop.xlane.xlu1 %455 }
 0x558   :  { %v465_v53 = vmul.f32 0.0078125, %v462_v50  ;;  %v458_v54 = vmul.f32 0.0078125, %v456_v51 }
 0x559   :  { %v464_v55 = vpop.xlane.xlu2 %463 }
 0x55a   :  { %v469_v56 = vsub.f32 %v465_v53, %v467_v52  ;;  %v468_v57 = vmul.f32 %v458_v54, %v458_v54  ;;  %v466_v58 = vmul.f32 0.0078125, %v464_v55  ;;  %v496_v20 = vsub.f32 %v447_v44, %v458_v54  ;;  %v547_v44 = vld [vmem:[%s1008_s16 + $0x8] sm:$0xff] }
 0x55c   :  { %v471_v59 = vadd.f32 1e-05, %v469_v56  ;;  %v470_v60 = vsub.f32 %v466_v58, %v468_v57 }
 0x55e   :  { %729 = vrsqrt.f32 %v471_v59  ;;  %v472_v61 = vadd.f32 1e-05, %v470_v60  ;;  %vm479_vm2 = vweird.f32 %v471_v59 }
 0x560   :  { %731 = vrsqrt.f32 %v472_v61  ;;  %vm489_vm5 = vweird.f32 %v472_v61 }
 0x564   :  { %v730_v62 = vpop.eup %729 }
 0x565   :  { %v474_v63 = vmul.f32 %v730_v62, %v471_v59  ;;  %vm480_vm1 = vweird.f32 %v730_v62 }
 0x566   :  { %v732_v2 = vpop.eup %731  ;;  %vm481_vm4 = vmor %vm479_vm2, %vm480_vm1 }
 0x567   :  { %v475_v3 = vmul.f32 %v730_v62, %v474_v63  ;;  %v484_v4 = vmul.f32 %v732_v2, %v472_v61  ;;  %vm490_vm3 = vweird.f32 %v732_v2 }
 0x568   :  { %vm491_vm6 = vmor %vm489_vm5, %vm490_vm3 }
 0x569   :  { %v476_v5 = vmul.f32 0.5, %v475_v3  ;;  %v485_v6 = vmul.f32 %v732_v2, %v484_v4 }
 0x56b   :  { %v477_v7 = vsub.f32 1.5, %v476_v5  ;;  %v486_v8 = vmul.f32 0.5, %v485_v6 }
 0x56d   :  { %v487_v9 = vsub.f32 1.5, %v486_v8  ;;  %v478_v11 = vmul.f32 %v730_v62, %v477_v7 }
 0x56f   :  { %v482_v12 = vsel %vm481_vm4, %v730_v62, %v478_v11  ;;  %v488_v14 = vmul.f32 %v732_v2, %v487_v9  ;;  %v512_v27 = vpop.permute.xlu1 %511 }
 0x570   :  { %v493_v15 = vmul.f32 %v482_v12, %v449_v10 }
 0x571   :  { %v492_v16 = vsel %vm491_vm6, %v732_v2, %v488_v14 }
 0x572   :  { %499 = vperm.xlu0 %721, %v493_v15   ;;  %v494_v17 = vmul.f32 %v492_v16, %v450_v13 }
 0x574   :  { %504 = vperm.xlu2 %723, %v494_v17  }
 0x57c   :  { %516 = vperm.xlu2 %723, %v452_v18  }
 0x5ce   :  { %v505_v19 = vpop.permute.xlu2 %504 }
 0x5cf   :  { %v508_v21 = vmul.f32 %v505_v19, %v496_v20 }
 0x5d6   :  { %v517_v22 = vpop.permute.xlu2 %516 }
 0x5d7   :  { %v956_v23 = vadd.f32 %v517_v22, %v508_v21 }
 0x5d9   :  { %539 = vmatpush.msra.mxu3 %v956_v23 }
 0x5e4   :  { %v500_v25 = vpop.permute.xlu0 %499 }
 0x5e5   :  { %v507_v26 = vmul.f32 %v500_v25, %v495_v24 }
 0x5e7   :  { %v960_v28 = vadd.f32 %v512_v27, %v507_v26 }
 0x5e9   :  { %540 = vmatpush.msra.mxu3 %v960_v28 }
 0x5ea   :  { %698 = vmatmul.msk.f32.vlgmr.msra.gmra.mxu3 %vm65_vm0, %v521_v29 }
 0x66d   :  { %v542_v32 = vpop.f32.mrf.mxu3 }
 0x66e   :  { %v548_v33 = vmul.f32 %v970_v30, %v542_v32  ;;  %v616_v34 = vmul.f32 %v614_v31, %v542_v32 }
 0x670   :  { %v617_v35 = vsel %vm549_vm7, %v616_v34, 0.0  ;;  %v550_v36 = vsel %vm549_vm7, %v548_v33, 0.0 }
 0x671   :  { %618 = vadd.xlane.f32.xlu2 %v617_v35  ;;  %551 = vadd.xlane.f32.xlu0 %v550_v36 }
 0x6e4   :  { %v619_v37 = vpop.xlane.xlu2 %618  ;;  %v552_v38 = vpop.xlane.xlu0 %551 }
 0x6e5   :  { %v620_v39 = vmul.f32 0.015625, %v619_v37  ;;  %v553_v40 = vmul.f32 0.015625, %v552_v38 }
 0x6e7   :  { %v621_v41 = vmax.f32 %v620_v39, 0.0  ;;  %v554_v42 = vmax.f32 %v553_v40, 0.0 }
 0x6e9   :  { %v622_v45 = vperm.slane %v621_v41, 0  ;;  %v555_v46 = vperm.slane %v554_v42, 0 }
 0x6eb   :  { %v623_v47 = vmul.f32 %v622_v45, %v546_v43  ;;  %v624_v48 = vmul.f32 %v622_v45, %v547_v44  ;;  %v556_v49 = vmul.f32 %v555_v46, %v546_v43  ;;  %v557_v50 = vmul.f32 %v555_v46, %v547_v44 }
 0x6ec   :  { %v675_v45 = vperm.slane %v970_v30, 1 }
 0x6ed   :  { %v701_v51 = vmul.f32 -1.442695, %v623_v47  ;;  %v702_v52 = vmul.f32 -1.442695, %v624_v48  ;;  %v699_v53 = vmul.f32 -1.442695, %v556_v49 }
 0x6ee   :  { %v700_v54 = vmul.f32 -1.442695, %v557_v50  ;;  %v608_v47 = vperm.slane %v970_v30, 0 }
 0x6ef   :  { %733 = vpow2.f32 %v701_v51 }
 0x6f0   :  { %735 = vpow2.f32 %v702_v52 }
 0x6f1   :  { %737 = vpow2.f32 %v699_v53 }
 0x6f2   :  { %739 = vpow2.f32 %v700_v54 }
 0x6f5   :  { %v734_v55 = vpop.eup %733 }
 0x6f6   :  { %v736_v56 = vpop.eup %735  ;;  %v633_v62 = vadd.f32 1.0, %v734_v55 }
 0x6f7   :  { %v738_v57 = vpop.eup %737  ;;  %v634_v58 = vadd.f32 1.0, %v736_v56 }
 0x6f8   :  { %v740_v59 = vpop.eup %739  ;;  %v566_v60 = vadd.f32 1.0, %v738_v57  ;;  %v646_v39 = vand.u32 2147483648, %v633_v62  ;;  %vm640_vm5 = vweird.f32 %v633_v62  ;;  %v644_v40 = vand.u32 2147483647, %v633_v62 }
 0x6f9   :  { %741 = vrcp.f32 %v634_v58  ;;  %v567_v61 = vadd.f32 1.0, %v740_v59  ;;  %v659_v8 = vand.u32 2147483647, %v634_v58  ;;  %v661_v9 = vand.u32 2147483648, %v634_v58 }
 0x6fa   :  { %743 = vrcp.f32 %v566_v60  ;;  %v579_v13 = vand.u32 2147483648, %v566_v60  ;;  %v577_v16 = vand.u32 2147483647, %v566_v60  ;;  %vm655_vm9 = vweird.f32 %v634_v58 }
 0x6fb   :  { %745 = vrcp.f32 %v567_v61  ;;  %vm573_vm10 = vweird.f32 %v566_v60  ;;  %v662_v18 = vor.u32 1.1754944e-38, %v661_v9  ;;  %vm660_vm12 = vcmp.eq.f32.partialorder %v659_v8, 8.507059e+37 }
 0x6fc   :  { %747 = vrcp.f32 %v633_v62  ;;  %v580_v24 = vor.u32 1.1754944e-38, %v579_v13  ;;  %vm578_vm14 = vcmp.eq.f32.partialorder %v577_v16, 8.507059e+37  ;;  %v594_v32 = vand.u32 2147483648, %v567_v61 }
 0x6fd   :  { %vm588_vm1 = vweird.f32 %v567_v61  ;;  %v592_v33 = vand.u32 2147483647, %v567_v61  ;;  %v647_v42 = vor.u32 1.1754944e-38, %v646_v39  ;;  %vm645_vm7 = vcmp.eq.f32.partialorder %v644_v40, 8.507059e+37 }
 0x6fe   :  { %v595_v36 = vor.u32 1.1754944e-38, %v594_v32 }
 0x6ff   :  { %v742_v63 = vpop.eup %741  ;;  %vm593_vm3 = vcmp.eq.f32.partialorder %v592_v33, 8.507059e+37 }
 0x700   :  { %v744_v2 = vpop.eup %743  ;;  %v651_v3 = vmul.f32 %v742_v63, %v634_v58  ;;  %vm656_vm0 = vweird.f32 %v742_v63 }
 0x701   :  { %v746_v4 = vpop.eup %745  ;;  %v569_v5 = vmul.f32 %v744_v2, %v566_v60  ;;  %vm574_vm8 = vweird.f32 %v744_v2  ;;  %vm657_vm11 = vmor %vm655_vm9, %vm656_vm0 }
 0x702   :  { %v652_v6 = vsub.f32 1.0, %v651_v3  ;;  %v584_v7 = vmul.f32 %v746_v4, %v567_v61  ;;  %v748_v11 = vpop.eup %747  ;;  %vm575_vm13 = vmor %vm573_vm10, %vm574_vm8  ;;  %vm589_vm15 = vweird.f32 %v746_v4 }
 0x703   :  { %v570_v10 = vsub.f32 1.0, %v569_v5  ;;  %v636_v21 = vmul.f32 %v748_v11, %v633_v62  ;;  %vm590_vm2 = vmor %vm588_vm1, %vm589_vm15  ;;  %vm641_vm4 = vweird.f32 %v748_v11 }
 0x704   :  { %v653_v12 = vmul.f32 %v742_v63, %v652_v6  ;;  %v585_v14 = vsub.f32 1.0, %v584_v7  ;;  %vm642_vm6 = vmor %vm640_vm5, %vm641_vm4 }
 0x705   :  { %v571_v15 = vmul.f32 %v744_v2, %v570_v10  ;;  %v637_v31 = vsub.f32 1.0, %v636_v21 }
 0x706   :  { %v654_v17 = vadd.f32 %v742_v63, %v653_v12  ;;  %v586_v20 = vmul.f32 %v746_v4, %v585_v14 }
 0x707   :  { %v572_v19 = vadd.f32 %v744_v2, %v571_v15  ;;  %v638_v35 = vmul.f32 %v748_v11, %v637_v31 }
 0x708   :  { %v658_v22 = vsel %vm657_vm11, %v742_v63, %v654_v17  ;;  %v587_v29 = vadd.f32 %v746_v4, %v586_v20 }
 0x709   :  { %v663_v25 = vsel %vm660_vm12, %v662_v18, %v658_v22  ;;  %v576_v26 = vsel %vm575_vm13, %v744_v2, %v572_v19  ;;  %v639_v38 = vadd.f32 %v748_v11, %v638_v35 }
 0x70a   :  { %672 = vperm.xlu0 %721, %v663_v25   ;;  %v581_v27 = vsel %vm578_vm14, %v580_v24, %v576_v26  ;;  %v591_v34 = vsel %vm590_vm2, %v746_v4, %v587_v29 }
 0x70b   :  { %600 = vperm.xlu1 %722, %v581_v27   ;;  %v596_v37 = vsel %vm593_vm3, %v595_v36, %v591_v34  ;;  %v643_v41 = vsel %vm642_vm6, %v748_v11, %v639_v38 }
 0x70c   :  { %v648_v43 = vsel %vm645_vm7, %v647_v42, %v643_v41 }
 0x713   :  { %605 = vperm.xlu1 %722, %v596_v37  }
 0x71b   :  { %667 = vperm.xlu1 %722, %v648_v43  }
 0x77c   :  { %v673_v46 = vpop.permute.xlu0 %672 }
 0x77d   :  { %v601_v44 = vpop.permute.xlu1 %600  ;;  %v677_v49 = vmul.f32 %v675_v45, %v673_v46 }
 0x77e   :  { %v609_v55 = vmul.f32 %v608_v47, %v601_v44 }
 0x785   :  { %v606_v48 = vpop.permute.xlu1 %605 }
 0x786   :  { %v610_v50 = vmul.f32 %v608_v47, %v606_v48 }
 0x788   :  { %v679_v51 = vadd.f32 %v677_v49, %v610_v50 }
 0x78a   :  { %v681_v52 = vmul.f32 %v679_v51, %v956_v23 }
 0x78c   :  { %v683_v53 = vadd.f32 %v681_v52, %v860_v0 }
 0x78d   :  { %v668_v54 = vpop.permute.xlu1 %667 }
 0x78e   :  { %v685_v56 = vmax.f32 %v683_v53, 0.0  ;;  %v676_v57 = vmul.f32 %v675_v45, %v668_v54 }
 0x790   :  { %687 = vst [vmem:[%s1009_s17 + $0x8] sm:$0xff] %v685_v56  ;;  %v678_v58 = vadd.f32 %v676_v57, %v609_v55 }
 0x792   :  { %v680_v59 = vmul.f32 %v678_v58, %v960_v28 }
 0x794   :  { %v682_v30 = vadd.f32 %v680_v59, %v865_v1 }
 0x796   :  { %v684_v60 = vmax.f32 %v682_v30, 0.0 }
 0x798   :  { %686 = vst [vmem:[%s1009_s17] sm:$0xff] %v684_v60 }

</bundles_post_ra>
